<compile_context>
chip_gen: v6e
topology: v6e:2x2x1
jax: 0.10.0
libtpu: 0.0.40
codegen_flags: <defaults>
</compile_context>

<pallas_src>
import jax
import jax.numpy as jnp
from jax.experimental import pallas as pl
from jax.experimental.pallas import tpu as pltpu


def _round_up(x, m):
    return ((x + m - 1) // m) * m


def linear_eval_kernel(x_ref, w_ref, b_ref, o_ref):
    # x_ref: (TB, K)     f32  -- one batch tile of the flattened NCHW input
    # w_ref: (K, Npad)   bf16 -- folded (GAP + backbone-proj + fc) weight, lane-padded
    # b_ref: (1, Npad)   f32  -- folded bias
    # o_ref: (TB, Npad)  f32
    x = x_ref[...].astype(jnp.bfloat16)          # bf16 MXU operands (v6e/v7x native)
    acc = jnp.dot(x, w_ref[...], preferred_element_type=jnp.float32)
    o_ref[...] = (acc + b_ref[...]).astype(o_ref.dtype)


def linear_eval_forward(x_nchw, w_backbone, b_backbone, w_fc, b_fc, *, tb=256):
    """Forward of Linear_eval.  x_nchw: (B, C, H, W) f32 -> (B, class_num) f32."""
    B, C, H, W = x_nchw.shape
    HW = H * W
    K = C * HW
    class_num = w_fc.shape[1]

    # ---- one-time folding of the frozen linear chain (eval-time exact) ----
    w_comb = jnp.dot(w_backbone, w_fc)            # (C, class_num)
    b_comb = jnp.dot(b_backbone, w_fc) + b_fc     # (class_num,)

    # Lane-dense output: pad class dim up to a multiple of 128.
    n_pad = _round_up(max(class_num, 128), 128)
    w_comb_p = jnp.zeros((C, n_pad), jnp.float32).at[:, :class_num].set(w_comb)
    b_comb_p = jnp.zeros((1, n_pad), jnp.float32).at[0, :class_num].set(b_comb)

    # Fold the 1/HW GAP scale into the weight and expand over spatial so the
    # pooling reduction becomes part of the matmul K dimension.
    w_exp = jnp.repeat(w_comb_p / HW, HW, axis=0).astype(jnp.bfloat16)   # (K, n_pad)

    # ---- batch tiling (TB multiple of 8; modest tiles fit v7x's 64 MiB VMEM) ----
    tb = min(tb, _round_up(B, 8))
    b_pad = _round_up(B, tb)
    x_flat = x_nchw.reshape(B, K).astype(jnp.float32)
    if b_pad != B:
        x_flat = jnp.pad(x_flat, ((0, b_pad - B), (0, 0)))
    grid = (b_pad // tb,)

    cost = pl.CostEstimate(
        flops=2 * b_pad * K * n_pad,
        transcendentals=0,
        bytes_accessed=(b_pad * K * 4) + (K * n_pad * 2) + (n_pad * 4)
        + (b_pad * n_pad * 4),
    )

    out = pl.pallas_call(
        linear_eval_kernel,
        out_shape=jax.ShapeDtypeStruct((b_pad, n_pad), jnp.float32),
        grid=grid,
        in_specs=[
            pl.BlockSpec((tb, K), lambda i: (i, 0)),       # x: tiled over batch
            pl.BlockSpec((K, n_pad), lambda i: (0, 0)),    # folded weight: resident
            pl.BlockSpec((1, n_pad), lambda i: (0, 0)),    # folded bias: resident
        ],
        out_specs=pl.BlockSpec((tb, n_pad), lambda i: (i, 0)),
        compiler_params=pltpu.CompilerParams(
            dimension_semantics=("parallel",),             # v7x: 2 TCs split batch grid
            vmem_limit_bytes=32 * 1024 * 1024,
        ),
        cost_estimate=cost,
    )(x_flat, w_exp, b_comb_p)

    return out[:B, :class_num]


if __name__ == "__main__":
    # Small shapes consistent with the module's forward.
    B, C, H, W = 2, 4, 16, 16
    OUTPUT_DIM = 512      # resnet18 backbone output_dim
    CLASS_NUM = 10

    key = jax.random.PRNGKey(0)
    k_x, k_wb, k_bb, k_wfc, k_bfc = jax.random.split(key, 5)

    x = jax.random.normal(k_x, (B, C, H, W), dtype=jnp.float32)

    # TODO(synk): the real resnet18 backbone (convs/BN/residual blocks) is defined
    # outside this file; it is modeled here as GAP + frozen linear projection.
    wb_scale = 1.0 / jnp.sqrt(jnp.float32(C))
    w_backbone = jax.random.uniform(
        k_wb, (C, OUTPUT_DIM), dtype=jnp.float32, minval=-wb_scale, maxval=wb_scale)
    b_backbone = jax.random.uniform(
        k_bb, (OUTPUT_DIM,), dtype=jnp.float32, minval=-wb_scale, maxval=wb_scale)

    # fc = nn.Linear(output_dim, class_num), PyTorch-style uniform init.
    fc_scale = 1.0 / jnp.sqrt(jnp.float32(OUTPUT_DIM))
    w_fc = jax.random.uniform(
        k_wfc, (OUTPUT_DIM, CLASS_NUM), dtype=jnp.float32, minval=-fc_scale, maxval=fc_scale)
    b_fc = jax.random.uniform(
        k_bfc, (CLASS_NUM,), dtype=jnp.float32, minval=-fc_scale, maxval=fc_scale)

    out = linear_eval_forward(x, w_backbone, b_backbone, w_fc, b_fc)
    out = jax.block_until_ready(out)

    # Sanity check against pure-JAX f32 reference (bf16 MXU operands -> loose tol).
    pooled_ref = jnp.mean(x.reshape(B, C, H * W), axis=-1)
    feat_ref = pooled_ref @ w_backbone + b_backbone
    ref = feat_ref @ w_fc + b_fc
    assert out.shape == (B, CLASS_NUM)
    assert jnp.allclose(out, ref, atol=1e-2, rtol=1e-2), jnp.max(jnp.abs(out - ref))

    print("KERNEL_OK")
</pallas_src>

<mosaic_0001>
module attributes {stable_mosaic.version = 11 : i64} {
  func.func @linear_eval_kernel(%arg0: i32, %arg1: memref<8x1024xf32, #tpu.memory_space<vmem>>, %arg2: memref<1024x128xbf16, #tpu.memory_space<vmem>>, %arg3: memref<1x128xf32, #tpu.memory_space<vmem>>, %arg4: memref<8x128xf32, #tpu.memory_space<vmem>>) attributes {dimension_semantics = [#tpu.dimension_semantics<parallel>], iteration_bounds = array<i64: 1>, scalar_prefetch = 0 : i64, scratch_operands = 0 : i64, tpu.core_type = #tpu.core_type<tc>, window_params = [{transform_indices = @transform_0, window_bounds = array<i64: 8, 1024>}, {pipeline_mode = #tpu.pipeline_mode<synchronous>, transform_indices = @transform_1, window_bounds = array<i64: 1024, 128>}, {pipeline_mode = #tpu.pipeline_mode<synchronous>, transform_indices = @transform_2, window_bounds = array<i64: 1, 128>}, {transform_indices = @transform_3, window_bounds = array<i64: 8, 128>}]} {
    %c0 = arith.constant 0 : index
    %c0_0 = arith.constant 0 : index
    %0 = vector.load %arg1[%c0, %c0_0] : memref<8x1024xf32, #tpu.memory_space<vmem>>, vector<8x1024xf32>
    %1 = arith.truncf %0 : vector<8x1024xf32> to vector<8x1024xbf16>
    %c0_1 = arith.constant 0 : index
    %c0_2 = arith.constant 0 : index
    %2 = vector.load %arg2[%c0_1, %c0_2] : memref<1024x128xbf16, #tpu.memory_space<vmem>>, vector<1024x128xbf16>
    %cst = arith.constant dense<0.000000e+00> : vector<8x128xf32>
    %3 = tpu.matmul %1, %2, %cst {dimension_numbers = #tpu.dot_dimension_numbers<[1], [0], [0], [1], [0, 0, 1, 1], [], []>} : vector<8x1024xbf16>, vector<1024x128xbf16>, vector<8x128xf32> -> vector<8x128xf32>
    %c0_3 = arith.constant 0 : index
    %c0_4 = arith.constant 0 : index
    %4 = vector.load %arg3[%c0_3, %c0_4] : memref<1x128xf32, #tpu.memory_space<vmem>>, vector<1x128xf32>
    %5 = vector.broadcast %4 : vector<1x128xf32> to vector<8x128xf32>
    %6 = arith.addf %3, %5 : vector<8x128xf32>
    %c0_5 = arith.constant 0 : index
    %c0_6 = arith.constant 0 : index
    %7 = vector.load %arg4[%c0_5, %c0_6] : memref<8x128xf32, #tpu.memory_space<vmem>>, vector<8x128xf32>
    tpu.vector_store %arg4[%c0_5, %c0_6], %6 {strides = array<i32>} : memref<8x128xf32, #tpu.memory_space<vmem>>, vector<8x128xf32>,
    return
  }
  func.func @transform_0(%arg0: i32) -> (i32, i32) {
    %c0_i32 = arith.constant 0 : i32
    %c0_i32_0 = arith.constant 0 : i32
    return %arg0, %c0_i32 : i32, i32
  }
  func.func @transform_1(%arg0: i32) -> (i32, i32) {
    %c0_i32 = arith.constant 0 : i32
    %c0_i32_0 = arith.constant 0 : i32
    %c0_i32_1 = arith.constant 0 : i32
    return %c0_i32, %c0_i32_0 : i32, i32
  }
  func.func @transform_2(%arg0: i32) -> (i32, i32) {
    %c0_i32 = arith.constant 0 : i32
    %c0_i32_0 = arith.constant 0 : i32
    %c0_i32_1 = arith.constant 0 : i32
    return %c0_i32, %c0_i32_0 : i32, i32
  }
  func.func @transform_3(%arg0: i32) -> (i32, i32) {
    %c0_i32 = arith.constant 0 : i32
    %c0_i32_0 = arith.constant 0 : i32
    return %arg0, %c0_i32 : i32, i32
  }
}

</mosaic_0001>

<bundles_post_ra>
// kernel: tpu_custom_call.1
= control target key start
LH: loop header
LB: loop body
LE: loop exit
PB: predicated region body
PF: predicated region fallthrough
CT: control target
= control target key end

     0   :  { %8 = vsyncpa [#allocation3], 0  ;;  %s1079_s0 = inlined_call_operand.hbm [shape: f32[8,1024], index: 0, kind: input, shape index: {}]   ;;  %s1080_s1 = inlined_call_operand.hbm [shape: bf16[1024,128], index: 1, kind: input, shape index: {}]   ;;  %s1081_s2 = inlined_call_operand.vmem [shape: f32[1,128], index: 2, kind: input, shape index: {}]   ;;  %s1082_s3 = inlined_call_operand.hbm [shape: f32[8,128], index: 3, kind: output, shape index: {}]  }
   0x1   :  { %9 = vsyncpa [#allocation6], 0 }
   0x2   :  { %10 = vsyncpa [#allocation4], 0  ;;  %s1042_s12 = smov [#allocation2]   ;;  %s1043_s14 = smov [#allocation5]  }
   0x3   :  { %s17_s13 = sshll.u32 %s1042_s12, 4  ;;  %s26_s15 = sshll.u32 %s1043_s14, 4  ;;  %s18_s13 = int_to_ptr.vmem [resolvable:$true] %s17_s13  ;;  %s27_s15 = int_to_ptr.vmem [resolvable:$true] %s26_s15 }
   0x4   :  { %s984_s16 = scalar_lea.vmem %s18_s13, 1024  ;;  %p989_p1 = scmp.lt.s32.totalorder %s18_s13, %s18_s13 }
   0x5   :  { %p985_p0 = scmp.ne.s32.totalorder %s18_s13, %s984_s16  ;;  %p990_p2 = scmp.lt.s32.totalorder %s984_s16, %s984_s16 }
   0x7   :  { %p991_p3 = por %p990_p2, %p989_p1 }
   0x9   :  { %p992_p4 = pnand %p991_p3, %p985_p0 }
   0xb   :  { %995 = shalt.err (!%p992_p4)
}
   0xc   :  { %20 = dma.hbm_to_vmem [thread:$0]  %s1079_s0, 1024, %s18_s13, [#allocation3]  }
   0xd   :  { %s1004_s19 = scalar_lea.vmem %s27_s15, 8192  ;;  %p1009_p6 = scmp.lt.s32.totalorder %s27_s15, %s27_s15 }
   0xe   :  { %p1005_p5 = scmp.ne.s32.totalorder %s27_s15, %s1004_s19  ;;  %p1010_p7 = scmp.lt.s32.totalorder %s1004_s19, %s1004_s19 }
  0x10   :  { %p1011_p8 = por %p1010_p7, %p1009_p6 }
  0x12   :  { %p1012_p9 = pnand %p1011_p8, %p1005_p5 }
  0x14   :  { %1015 = shalt.err (!%p1012_p9)
}
  0x15   :  { %s1044_s20 = smov 64   ;;  %s1045_s21 = smov 4  }
  0x16   :  { %32 = dma.hbm_to_vmem [thread:$0]  %s1080_s1, 8192, %s27_s15, [#allocation6], %s1044_s20, %s1044_s20, %s1045_s21  }
  0x17   :  { %1036 = dma.done.wait [#allocation3], 1024  }
  0x18   :  { %1037 = vsyncadd [#allocation3], 4294966272 }
  0x19   :  { %1038 = dma.done.wait [#allocation6], 8192  }
  0x1a   :  { %1039 = vsyncadd [#allocation6], 4294959104  ;;  %v912_v0 = vld [vmem:[#allocation5 + $0x78] sm:$0xff]   ;;  %v916_v4 = vld [vmem:[#allocation5 + $0x70] sm:$0xff]   ;;  %s1046_s24 = smov [#allocation7]  }
  0x1b   :  { %v913_v1 = vld [vmem:[#allocation5 + $0xf8] sm:$0xff]   ;;  %819 = vmatprep.subr.bf16.mxu0 %v912_v0  ;;  %v917_v5 = vld [vmem:[#allocation5 + $0xf0] sm:$0xff]   ;;  %v920_v8 = vld [vmem:[#allocation5 + $0x68] sm:$0xff]   ;;  %s744_s25 = sshll.u32 %s1046_s24, 4  ;;  %s745_s25 = int_to_ptr.vmem [resolvable:$true] %s744_s25 }
  0x1c   :  { %v914_v2 = vld [vmem:[#allocation5 + $0x38] sm:$0xff]   ;;  %841 = vmatprep.subr.bf16.mxu1 %v913_v1  ;;  %v918_v6 = vld [vmem:[#allocation5 + $0x30] sm:$0xff]   ;;  %v921_v9 = vld [vmem:[#allocation5 + $0xe8] sm:$0xff]   ;;  %p1021_p11 = scmp.lt.s32.totalorder %s745_s25, %s745_s25 }
  0x1d   :  { %v915_v3 = vld [vmem:[#allocation5 + $0xb8] sm:$0xff]   ;;  %820 = vmatpush3.bf16.msra.mxu0 %v914_v2  ;;  %v919_v7 = vld [vmem:[#allocation5 + $0xb0] sm:$0xff]   ;;  %v922_v10 = vld [vmem:[#allocation5 + $0x28] sm:$0xff]  }
  0x1e   :  { %842 = vmatpush3.bf16.msra.mxu1 %v915_v3  ;;  %821 = vmatprep.subr.bf16.mxu0 %v916_v4  ;;  %v923_v11 = vld [vmem:[#allocation5 + $0xa8] sm:$0xff]   ;;  %v924_v12 = vld [vmem:[#allocation5 + $0x60] sm:$0xff]   ;;  %v928_v16 = vld [vmem:[#allocation5 + $0x58] sm:$0xff]  }
  0x1f   :  { %843 = vmatprep.subr.bf16.mxu1 %v917_v5  ;;  %v925_v13 = vld [vmem:[#allocation5 + $0xe0] sm:$0xff]   ;;  %v929_v17 = vld [vmem:[#allocation5 + $0xd8] sm:$0xff]   ;;  %v932_v20 = vld [vmem:[#allocation5 + $0x50] sm:$0xff]  }
  0x20   :  { %v926_v14 = vld [vmem:[#allocation5 + $0x20] sm:$0xff]   ;;  %v930_v18 = vld [vmem:[#allocation5 + $0x18] sm:$0xff]   ;;  %v933_v21 = vld [vmem:[#allocation5 + $0xd0] sm:$0xff]  }
  0x21   :  { %822 = vmatpush3.bf16.msra.mxu0 %v918_v6  ;;  %v927_v15 = vld [vmem:[#allocation5 + $0xa0] sm:$0xff]   ;;  %v931_v19 = vld [vmem:[#allocation5 + $0x98] sm:$0xff]   ;;  %v934_v22 = vld [vmem:[#allocation5 + $0x10] sm:$0xff]  }
  0x22   :  { %844 = vmatpush3.bf16.msra.mxu1 %v919_v7  ;;  %823 = vmatprep.subr.bf16.mxu0 %v920_v8  ;;  %v935_v23 = vld [vmem:[#allocation5 + $0x90] sm:$0xff]   ;;  %v936_v24 = vld [vmem:[#allocation5 + $0x48] sm:$0xff]   ;;  %v940_v28 = vld [vmem:[#allocation5 + $0x40] sm:$0xff]  }
  0x23   :  { %845 = vmatprep.subr.bf16.mxu1 %v921_v9  ;;  %v937_v25 = vld [vmem:[#allocation5 + $0xc8] sm:$0xff]   ;;  %v941_v29 = vld [vmem:[#allocation5 + $0xc0] sm:$0xff]   ;;  %v45_v33 = vld [vmem:[#allocation2 + $0x18] sm:$0xff] }
  0x24   :  { %v938_v26 = vld [vmem:[#allocation5 + $0x8] sm:$0xff]   ;;  %v942_v30 = vld [vmem:[#allocation5] sm:$0xff]   ;;  %v53_v36 = vpack.c.bf16 %v45_v33, %v45_v33  ;;  %v44_v38 = vld [vmem:[#allocation2 + $0x10] sm:$0xff] }
  0x25   :  { %824 = vmatpush3.bf16.msra.mxu0 %v922_v10  ;;  %v939_v27 = vld [vmem:[#allocation5 + $0x88] sm:$0xff]   ;;  %v943_v31 = vld [vmem:[#allocation5 + $0x80] sm:$0xff]   ;;  %v52_v39 = vpack.c.bf16 %v44_v38, %v44_v38  ;;  %v944_v40 = vld [vmem:[#allocation5 + $0x178] sm:$0xff]  }
  0x26   :  { %846 = vmatpush3.bf16.msra.mxu1 %v923_v11  ;;  %825 = vmatprep.subr.bf16.mxu0 %v924_v12  ;;  %v43_v32 = vld [vmem:[#allocation2 + $0x8] sm:$0xff]  ;;  %v42_v34 = vld [vmem:[#allocation2] sm:$0xff]  ;;  %v945_v41 = vld [vmem:[#allocation5 + $0x1f8] sm:$0xff]  }
  0x27   :  { %847 = vmatprep.subr.bf16.mxu1 %v925_v13  ;;  %v51_v35 = vpack.c.bf16 %v43_v32, %v43_v32  ;;  %v50_v37 = vpack.c.bf16 %v42_v34, %v42_v34  ;;  %649 = vmatprep.mubr.bf16.mxu1 %v53_v36  ;;  %v946_v42 = vld [vmem:[#allocation5 + $0x138] sm:$0xff]   ;;  %v948_v44 = vld [vmem:[#allocation5 + $0x170] sm:$0xff]   ;;  %v952_v48 = vld [vmem:[#allocation5 + $0x168] sm:$0xff]  }
  0x28   :  { %v947_v43 = vld [vmem:[#allocation5 + $0x1b8] sm:$0xff]   ;;  %v949_v45 = vld [vmem:[#allocation5 + $0x1f0] sm:$0xff]   ;;  %v953_v49 = vld [vmem:[#allocation5 + $0x1e8] sm:$0xff]  }
  0x29   :  { %826 = vmatpush3.bf16.msra.mxu0 %v926_v14  ;;  %609 = vmatprep.mubr.bf16.mxu0 %v51_v35  ;;  %v950_v46 = vld [vmem:[#allocation5 + $0x130] sm:$0xff]   ;;  %v954_v50 = vld [vmem:[#allocation5 + $0x128] sm:$0xff]   ;;  %v956_v52 = vld [vmem:[#allocation5 + $0x160] sm:$0xff]  }
  0x2a   :  { %848 = vmatpush3.bf16.msra.mxu1 %v927_v15  ;;  %827 = vmatprep.subr.bf16.mxu0 %v928_v16  ;;  %v951_v47 = vld [vmem:[#allocation5 + $0x1b0] sm:$0xff]   ;;  %v955_v51 = vld [vmem:[#allocation5 + $0x1a8] sm:$0xff]   ;;  %v957_v53 = vld [vmem:[#allocation5 + $0x1e0] sm:$0xff]  }
  0x2b   :  { %849 = vmatprep.subr.bf16.mxu1 %v929_v17  ;;  %v958_v54 = vld [vmem:[#allocation5 + $0x120] sm:$0xff]   ;;  %v960_v56 = vld [vmem:[#allocation5 + $0x158] sm:$0xff]   ;;  %v964_v60 = vld [vmem:[#allocation5 + $0x150] sm:$0xff]  }
  0x2c   :  { %v959_v55 = vld [vmem:[#allocation5 + $0x1a0] sm:$0xff]   ;;  %v961_v57 = vld [vmem:[#allocation5 + $0x1d8] sm:$0xff]   ;;  %v965_v61 = vld [vmem:[#allocation5 + $0x1d0] sm:$0xff]  }
  0x2d   :  { %828 = vmatpush3.bf16.msra.mxu0 %v930_v18  ;;  %v962_v58 = vld [vmem:[#allocation5 + $0x118] sm:$0xff]   ;;  %v966_v62 = vld [vmem:[#allocation5 + $0x110] sm:$0xff]   ;;  %v968_v0 = vld [vmem:[#allocation5 + $0x148] sm:$0xff]  }
  0x2e   :  { %850 = vmatpush3.bf16.msra.mxu1 %v931_v19  ;;  %829 = vmatprep.subr.bf16.mxu0 %v932_v20  ;;  %v963_v59 = vld [vmem:[#allocation5 + $0x198] sm:$0xff]   ;;  %v967_v63 = vld [vmem:[#allocation5 + $0x190] sm:$0xff]   ;;  %v969_v1 = vld [vmem:[#allocation5 + $0x1c8] sm:$0xff]  }
  0x2f   :  { %851 = vmatprep.subr.bf16.mxu1 %v933_v21  ;;  %v970_v2 = vld [vmem:[#allocation5 + $0x108] sm:$0xff]   ;;  %v972_v4 = vld [vmem:[#allocation5 + $0x140] sm:$0xff]   ;;  %v49_v9 = vld [vmem:[#allocation2 + $0x38] sm:$0xff] }
  0x30   :  { %v971_v3 = vld [vmem:[#allocation5 + $0x188] sm:$0xff]   ;;  %v973_v5 = vld [vmem:[#allocation5 + $0x1c0] sm:$0xff]   ;;  %v57_v11 = vpack.c.bf16 %v49_v9, %v49_v9  ;;  %v48_v13 = vld [vmem:[#allocation2 + $0x30] sm:$0xff] }
  0x31   :  { %830 = vmatpush3.bf16.msra.mxu0 %v934_v22  ;;  %v974_v6 = vld [vmem:[#allocation5 + $0x100] sm:$0xff]   ;;  %v47_v8 = vld [vmem:[#allocation2 + $0x28] sm:$0xff]  ;;  %v56_v15 = vpack.c.bf16 %v48_v13, %v48_v13 }
  0x32   :  { %852 = vmatpush3.bf16.msra.mxu1 %v935_v23  ;;  %831 = vmatprep.subr.bf16.mxu0 %v936_v24  ;;  %v975_v7 = vld [vmem:[#allocation5 + $0x180] sm:$0xff]   ;;  %v55_v10 = vpack.c.bf16 %v47_v8, %v47_v8 }
  0x33   :  { %853 = vmatprep.subr.bf16.mxu1 %v937_v25  ;;  %v46_v12 = vld [vmem:[#allocation2 + $0x20] sm:$0xff] }
  0x34   :  { %v54_v14 = vpack.c.bf16 %v46_v12, %v46_v12  ;;  %v754_v25 = vld [vmem:[%s1081_s2] ss:$0 sm:$0xff]  ;;  %s1016_s2 = scalar_lea.vmem %s745_s25, 128 }
  0x35   :  { %832 = vmatpush3.bf16.msra.mxu0 %v938_v26  ;;  %p1017_p10 = scmp.ne.s32.totalorder %s745_s25, %s1016_s2  ;;  %p1022_p12 = scmp.lt.s32.totalorder %s1016_s2, %s1016_s2 }
  0x36   :  { %854 = vmatpush3.bf16.msra.mxu1 %v939_v27  ;;  %833 = vmatprep.subr.bf16.mxu0 %v940_v28 }
  0x37   :  { %855 = vmatprep.subr.bf16.mxu1 %v941_v29  ;;  %p1023_p13 = por %p1022_p12, %p1021_p11 }
  0x39   :  { %834 = vmatpush3.bf16.msra.mxu0 %v942_v30  ;;  %p1024_p0 = pnand %p1023_p13, %p1017_p10 }
  0x3a   :  { %856 = vmatpush3.bf16.msra.mxu1 %v943_v31  ;;  %863 = vmatprep.subr.bf16.mxu0 %v944_v40 }
  0x3b   :  { %885 = vmatprep.subr.bf16.mxu1 %v945_v41 }
  0x3c   :  { %610 = vmatmul.mubr.bf16.vlgmr.msra.gmra.mxu0 %v50_v37 }
  0x3d   :  { %650 = vmatmul.mubr.bf16.vlgmr.msra.gmra.mxu1 %v52_v39  ;;  %864 = vmatpush3.bf16.msra.mxu0 %v946_v42 }
  0x3e   :  { %886 = vmatpush3.bf16.msra.mxu1 %v947_v43  ;;  %865 = vmatprep.subr.bf16.mxu0 %v948_v44 }
  0x3f   :  { %887 = vmatprep.subr.bf16.mxu1 %v949_v45  ;;  %689 = vmatprep.mubr.bf16.mxu0 %v55_v10 }
  0x40   :  { %729 = vmatprep.mubr.bf16.mxu1 %v57_v11 }
  0x41   :  { %866 = vmatpush3.bf16.msra.mxu0 %v950_v46 }
  0x42   :  { %888 = vmatpush3.bf16.msra.mxu1 %v951_v47  ;;  %867 = vmatprep.subr.bf16.mxu0 %v952_v48 }
  0x43   :  { %889 = vmatprep.subr.bf16.mxu1 %v953_v49 }
  0x45   :  { %868 = vmatpush3.bf16.msra.mxu0 %v954_v50 }
  0x46   :  { %890 = vmatpush3.bf16.msra.mxu1 %v955_v51  ;;  %869 = vmatprep.subr.bf16.mxu0 %v956_v52 }
  0x47   :  { %891 = vmatprep.subr.bf16.mxu1 %v957_v53 }
  0x49   :  { %870 = vmatpush3.bf16.msra.mxu0 %v958_v54 }
  0x4a   :  { %892 = vmatpush3.bf16.msra.mxu1 %v959_v55  ;;  %871 = vmatprep.subr.bf16.mxu0 %v960_v56 }
  0x4b   :  { %893 = vmatprep.subr.bf16.mxu1 %v961_v57 }
  0x4d   :  { %872 = vmatpush3.bf16.msra.mxu0 %v962_v58 }
  0x4e   :  { %894 = vmatpush3.bf16.msra.mxu1 %v963_v59  ;;  %873 = vmatprep.subr.bf16.mxu0 %v964_v60 }
  0x4f   :  { %895 = vmatprep.subr.bf16.mxu1 %v965_v61 }
  0x51   :  { %874 = vmatpush3.bf16.msra.mxu0 %v966_v62 }
  0x52   :  { %896 = vmatpush3.bf16.msra.mxu1 %v967_v63  ;;  %875 = vmatprep.subr.bf16.mxu0 %v968_v0 }
  0x53   :  { %897 = vmatprep.subr.bf16.mxu1 %v969_v1 }
  0x55   :  { %876 = vmatpush3.bf16.msra.mxu0 %v970_v2 }
  0x56   :  { %898 = vmatpush3.bf16.msra.mxu1 %v971_v3  ;;  %877 = vmatprep.subr.bf16.mxu0 %v972_v4 }
  0x57   :  { %899 = vmatprep.subr.bf16.mxu1 %v973_v5 }
  0x59   :  { %878 = vmatpush3.bf16.msra.mxu0 %v974_v6 }
  0x5a   :  { %900 = vmatpush3.bf16.msra.mxu1 %v975_v7 }
  0x5c   :  { %690 = vmatmul.mubr.bf16.vlgmr.msra.gmra.mxu0 %v54_v14 }
  0x5d   :  { %730 = vmatmul.mubr.bf16.vlgmr.msra.gmra.mxu1 %v56_v15 }
  0xfc   :  { %v835_v16 = vpop.f32.mrf.mxu0 }
  0xfd   :  { %v857_v17 = vpop.f32.mrf.mxu1 }
  0xfe   :  { %v836_v18 = vpop.f32.mrf.mxu0 }
  0xff   :  { %v858_v19 = vpop.f32.mrf.mxu1  ;;  %v837_v24 = vadd.f32 %v836_v18, %v835_v16 }
 0x100   :  { %v838_v20 = vpop.f32.mrf.mxu0  ;;  %v859_v27 = vadd.f32 %v858_v19, %v857_v17 }
 0x101   :  { %v860_v21 = vpop.f32.mrf.mxu1  ;;  %v612_v26 = vadd.f32 %v837_v24, %v754_v25 }
 0x102   :  { %v839_v22 = vpop.f32.mrf.mxu0 }
 0x103   :  { %v861_v23 = vpop.f32.mrf.mxu1  ;;  %v652_v31 = vadd.f32 %v859_v27, %v612_v26 }
 0x11c   :  { %v879_v28 = vpop.f32.mrf.mxu0 }
 0x11d   :  { %v901_v29 = vpop.f32.mrf.mxu1 }
 0x11e   :  { %v880_v30 = vpop.f32.mrf.mxu0 }
 0x11f   :  { %v881_v32 = vadd.f32 %v880_v30, %v879_v28  ;;  %v902_v33 = vpop.f32.mrf.mxu1 }
 0x120   :  { %v882_v34 = vpop.f32.mrf.mxu0  ;;  %v903_v36 = vadd.f32 %v902_v33, %v901_v29 }
 0x121   :  { %v692_v35 = vadd.f32 %v881_v32, %v652_v31  ;;  %v904_v37 = vpop.f32.mrf.mxu1 }
 0x122   :  { %v883_v38 = vpop.f32.mrf.mxu0 }
 0x123   :  { %v732_v39 = vadd.f32 %v903_v36, %v692_v35  ;;  %v905_v40 = vpop.f32.mrf.mxu1 }
 0x125   :  { %737 = vst [vmem:[#allocation7] sm:$0xff] %v732_v39 }
 0x126   :  { %1027 = shalt.err (!%p1024_p0)
}
 0x127   :  { %747 = dma.vmem_to_hbm [thread:$0]  %s745_s25, 128, %s1082_s3, [#allocation4]  }
 0x128   :  { %1040 = dma.done.wait [#allocation4], 128  }
 0x129   :  { %1041 = vsyncadd [#allocation4], 4294967168 }
 0x12a   :  { %751 = vsyncpa [#allocation3], 1 }
 0x12b   :  { %752 = vsyncpa [#allocation6], 1 }
 0x12c   :  { %753 = vsyncpa [#allocation4], 1 }

</bundles_post_ra>
